<compile_context>
chip_gen: v7x
topology: tpu7x:2x2x1
jax: 0.10.0
libtpu: 0.0.40
codegen_flags: <defaults>
</compile_context>

<pallas_src>
import numpy as np
import jax
import jax.numpy as jnp
from jax import lax
from jax.experimental import pallas as pl
from jax.experimental.pallas import tpu as pltpu

NEG_SLOPE = 0.01        # nn.LeakyReLU default negative_slope
EPS = 1e-6
TE_MAX = 2048           # edge-tile size (lanes)
TG_MAX = 1024           # generate-node-tile size (lanes)
VMEM_LIMIT = 48 * 1024 * 1024


def _round_up(x, m):
    return ((x + m - 1) // m) * m


# ---------------------------------------------------------------------------
# Pass 1: per-edge attention MLP + unit delta  ->  wu[8, E_pad] (bf16)
#   rows 0..2 of wu = attention * unit(pos[src]-pos[dst]); rows 3..7 are zero.
#   Masked / padded edges arrive with an all-zero delta column -> wu column 0.
# ---------------------------------------------------------------------------
def edge_att_kernel(aT_ref, w1T_ref, b1_ref, wc_ref, bc_ref, delta_ref, wu_ref):
    # per-head Linear folded into one block-diagonal bf16 MXU matmul (f32 acc)
    h = jnp.dot(w1T_ref[...], aT_ref[...],
                preferred_element_type=jnp.float32) + b1_ref[...]       # [HD2, TE]
    # Dropout (eval) = identity; LeakyReLU
    h = jnp.where(h >= 0, h, NEG_SLOPE * h)
    # second Linear + head-mixing Linear folded to one column: VPU mul +
    # sublane reduce (XLU); folded bias scalar from SMEM.
    att = jnp.sum(h * wc_ref[...], axis=0, keepdims=True) + bc_ref[0]   # [1, TE]

    delta = delta_ref[...]                                              # [8, TE]
    nrm = jnp.sqrt(jnp.sum(delta * delta, axis=0, keepdims=True))       # [1, TE]
    unit = delta * pl.reciprocal(nrm + EPS, approx=True)                # [8, TE]
    wu_ref[...] = (unit * att).astype(wu_ref.dtype)                     # bf16


# ---------------------------------------------------------------------------
# Pass 2: scatter-add via a bf16 one-hot MXU matmul.
#   out[:, p*n_g+g block] accumulates  wu[8, TE] @ onehot[TE, TG]  over E tiles.
# ---------------------------------------------------------------------------
def scatter_kernel(col_ref, wu_ref, out_ref):
    tg = out_ref.shape[-1]

    @pl.when(pl.program_id(2) == 0)
    def _init():
        out_ref[...] = jnp.zeros_like(out_ref)

    gcols = lax.broadcasted_iota(jnp.int32, (1, tg), 1) + pl.program_id(1) * tg
    # 0/1 one-hot built from int32 target-column ids; col == -1 (masked-out /
    # non-generate src / padding) never matches -> contributes nothing.
    scat = jnp.where(col_ref[...] == gcols,
                     jnp.bfloat16(1.0), jnp.bfloat16(0.0))               # [TE, TG]
    # single-pass bf16 MXU matmul, f32 accumulation into the resident block.
    out_ref[...] += jnp.dot(wu_ref[...], scat,
                            preferred_element_type=jnp.float32)          # [8, TG]


def coords_update_pallas(a_ij, pos, generate_node_dist, edge_index,
                         generate_node_idxes, mask_edge_inv, params):
    """a_ij:[E,H,Dh], pos:[N,3], generate_node_dist:[G,1], edge_index:[2,E](int),
    generate_node_idxes:[G](int), mask_edge_inv:[E,1](bool).  Returns [G,3]."""
    W1, b1, W2, b2, Wh = params            # torch Linear layout: W[out, in]
    E, H, Dh = a_ij.shape
    D2 = W1.shape[0]
    G = generate_node_idxes.shape[0]
    N = pos.shape[0]
    HD, HD2 = H * Dh, H * D2

    # ---- tile sizes / padding (lane-friendly multiples of 128) ----
    TE = min(TE_MAX, _round_up(max(E, 128), 128))
    n_e = _round_up(max(E, 1), TE) // TE
    P = 2 if n_e >= 2 else 1               # split the E reduction (v7x 2nd core)
    n_e = _round_up(n_e, P)
    E_pad = n_e * TE
    n_e_pp = n_e // P

    G_pad = _round_up(max(G, 128), 128)
    TG = min(TG_MAX, G_pad)
    G_pad = _round_up(G_pad, TG)
    n_g = G_pad // TG

    # ---- folded MLP weights (edges-on-lanes orientation) ----
    w1T = jnp.kron(jnp.eye(H, dtype=jnp.float32),
                   W1.astype(jnp.float32)).astype(jnp.bfloat16)          # [HD2, HD]
    b1_col = jnp.tile(b1.astype(jnp.float32), (H,)).reshape(HD2, 1)      # [HD2, 1]
    wc_col = jnp.outer(Wh[0], W2[0]).reshape(HD2, 1).astype(jnp.float32) # [HD2, 1]
    bcomb = (b2[0] * jnp.sum(Wh)).astype(jnp.float32).reshape(1)         # SMEM scalar

    # ---- pass-1 operands ----
    aT = a_ij.reshape(E, HD).astype(jnp.bfloat16).T                      # [HD, E]
    aT = jnp.pad(aT, ((0, 0), (0, E_pad - E)))
    pos_f = pos.astype(jnp.float32)
    d3 = pos_f[edge_index[0]] - pos_f[edge_index[1]]                     # [E, 3]
    d3 = jnp.where(mask_edge_inv.reshape(E, 1), 0.0, d3)                 # fold mask
    delta = jnp.zeros((8, E_pad), jnp.float32).at[:3, :E].set(d3.T)

    wu = pl.pallas_call(
        edge_att_kernel,
        out_shape=jax.ShapeDtypeStruct((8, E_pad), jnp.bfloat16),
        grid=(n_e,),
        in_specs=[
            pl.BlockSpec((HD, TE), lambda e: (0, e)),           # aT (streamed)
            pl.BlockSpec((HD2, HD), lambda e: (0, 0)),          # w1T (resident)
            pl.BlockSpec((HD2, 1), lambda e: (0, 0)),           # b1  (resident)
            pl.BlockSpec((HD2, 1), lambda e: (0, 0)),           # wc  (resident)
            pl.BlockSpec(memory_space=pltpu.MemorySpace.SMEM),  # folded bias
            pl.BlockSpec((8, TE), lambda e: (0, e)),            # delta (streamed)
        ],
        out_specs=pl.BlockSpec((8, TE), lambda e: (0, e)),
        compiler_params=pltpu.CompilerParams(
            dimension_semantics=("parallel",),
            vmem_limit_bytes=VMEM_LIMIT),
    )(aT, w1T, b1_col, wc_col, bcomb, delta)

    # ---- pass-2 operands: per-edge target column within the generate list ----
    node_to_col = jnp.full((N,), -1, jnp.int32).at[
        generate_node_idxes.astype(jnp.int32)].set(jnp.arange(G, dtype=jnp.int32))
    col = node_to_col[edge_index[0].astype(jnp.int32)]                   # isin() filter
    col = jnp.pad(col, (0, E_pad - E), constant_values=-1).reshape(E_pad, 1)
    # NOTE: col keeps a (TE, 1) int32 block (lane-padded in VMEM, ~TE*0.5KB per
    # buffer).  This avoids an in-kernel lane->sublane relayout and is small
    # next to pass-2's [TE, TG] bf16 scat temp.

    partial = pl.pallas_call(
        scatter_kernel,
        out_shape=jax.ShapeDtypeStruct((8, P * G_pad), jnp.float32),
        grid=(P, n_g, n_e_pp),
        in_specs=[
            pl.BlockSpec((TE, 1), lambda p, g, e: (p * n_e_pp + e, 0)),  # col
            pl.BlockSpec((8, TE), lambda p, g, e: (0, p * n_e_pp + e)),  # wu
        ],
        out_specs=pl.BlockSpec((8, TG), lambda p, g, e: (0, p * n_g + g)),
        compiler_params=pltpu.CompilerParams(
            dimension_semantics=("parallel", "parallel", "arbitrary"),
            vmem_limit_bytes=VMEM_LIMIT),
    )(col, wu)

    # ---- tiny epilogue (O(G)): combine P partials, per-node normalize * d_ij ----
    acc = partial.reshape(8, P, G_pad).sum(axis=1)                       # [8, G_pad]
    acc3 = acc[:3, :G].T                                                 # [G, 3]
    nrm = jnp.sqrt(jnp.sum(acc3 * acc3, axis=-1, keepdims=True))
    return acc3 / (nrm + EPS) * generate_node_dist.reshape(G, 1).astype(jnp.float32)


# ---------------------------------------------------------------------------
# NumPy reference (mirrors the kernel's intended mixed precision: bf16 a_ij/W1
# and bf16 per-edge contributions, f32 accumulation).
# ---------------------------------------------------------------------------
def _bf16_np(x):
    return np.asarray(jnp.asarray(x, jnp.float32).astype(jnp.bfloat16)
                      .astype(jnp.float32))


def reference_numpy(a_ij, pos, gen_dist, edge_index, gen_idx, mask_edge_inv, params):
    W1, b1, W2, b2, Wh = [np.asarray(p, np.float32) for p in params]
    a_ij = np.asarray(a_ij, np.float32)
    pos = np.asarray(pos, np.float32)
    gen_dist = np.asarray(gen_dist, np.float32)
    edge_index = np.asarray(edge_index)
    gen_idx = np.asarray(gen_idx)
    mask_edge_inv = np.asarray(mask_edge_inv)

    emask = np.isin(edge_index[0], gen_idx)
    mi = mask_edge_inv[:, 0][emask]
    ei = edge_index[:, emask]
    a = a_ij[emask]
    dx = pos[ei[0]] - pos[ei[1]]
    dx = dx / (np.linalg.norm(dx, axis=-1, keepdims=True) + EPS)
    dx[mi] = 0.0
    h = a @ W1.T + b1
    h = np.where(h >= 0, h, NEG_SLOPE * h)
    s = (h @ W2.T + b2)[..., 0]                   # [E', H]
    att = s @ Wh.T                                # [E', 1]
    wu = _bf16_np(dx * att)                       # mirror bf16 edge contributions
    out = np.zeros((pos.shape[0], 3), np.float32)
    np.add.at(out, ei[0], wu)
    out = out[gen_idx]
    out = out / (np.linalg.norm(out, axis=-1, keepdims=True) + EPS) * gen_dist
    return out


if __name__ == "__main__":
    # small synthetic problem
    dim_dh, num_head = 32, 4
    N, pro_nodes_num = 16, 8
    G = N - pro_nodes_num
    E = 64

    key = jax.random.PRNGKey(0)
    ks = jax.random.split(key, 10)

    # deterministic "module" parameters (torch Linear layout: [out, in])
    W1 = 0.1 * jax.random.normal(ks[0], (dim_dh // 2, dim_dh), jnp.float32)
    b1 = 0.1 * jax.random.normal(ks[1], (dim_dh // 2,), jnp.float32)
    W2 = 0.1 * jax.random.normal(ks[2], (1, dim_dh // 2), jnp.float32)
    b2 = 0.1 * jax.random.normal(ks[3], (1,), jnp.float32)
    Wh = 0.1 * jax.random.normal(ks[4], (1, num_head), jnp.float32)
    params = (W1, b1, W2, b2, Wh)

    # forward inputs
    a_ij = jax.random.normal(ks[5], (E, num_head, dim_dh), jnp.float32)
    pos = jax.random.normal(ks[6], (N, 3), jnp.float32)
    generate_node_idxes = jnp.arange(pro_nodes_num, N, dtype=jnp.int32)   # [G]
    generate_node_dist = jax.random.uniform(ks[7], (G, 1), jnp.float32, 0.5, 2.0)
    edge_index = jax.random.randint(ks[8], (2, E), 0, N, jnp.int32)
    mask_edge_inv = jax.random.uniform(ks[9], (E, 1)) < 0.2               # bool
    parent_node_idxes = jnp.arange(G, dtype=jnp.int32)  # unused in forward (parity w/ torch)

    out = coords_update_pallas(a_ij, pos, generate_node_dist, edge_index,
                               generate_node_idxes, mask_edge_inv, params)
    out = jax.block_until_ready(out)

    # Reference mirrors the kernel's mixed precision (bf16 a_ij/W1 operands and
    # bf16 per-edge contributions, f32 accumulation); tolerance additionally
    # covers the in-kernel approximate-reciprocal normalization.  Structural
    # bugs (scatter / mask / weight folding) produce O(1) errors.
    a_q = _bf16_np(a_ij)
    W1_q = _bf16_np(W1)
    ref = reference_numpy(a_q, pos, generate_node_dist, edge_index,
                          generate_node_idxes, mask_edge_inv,
                          (W1_q, b1, W2, b2, Wh))
    np.testing.assert_allclose(np.asarray(out), ref, rtol=2e-2, atol=5e-3)
    print("KERNEL_OK")
</pallas_src>

<mosaic_0001>
module attributes {stable_mosaic.version = 11 : i64} {
  func.func @edge_att_kernel(%arg0: i32, %arg1: memref<128x128xbf16, #tpu.memory_space<vmem>>, %arg2: memref<64x128xbf16, #tpu.memory_space<vmem>>, %arg3: memref<64x1xf32, #tpu.memory_space<vmem>>, %arg4: memref<64x1xf32, #tpu.memory_space<vmem>>, %arg5: memref<1xf32, #tpu.memory_space<smem>>, %arg6: memref<8x128xf32, #tpu.memory_space<vmem>>, %arg7: memref<8x128xbf16, #tpu.memory_space<vmem>>) attributes {dimension_semantics = [#tpu.dimension_semantics<parallel>], iteration_bounds = array<i64: 1>, scalar_prefetch = 0 : i64, scratch_operands = 0 : i64, tpu.core_type = #tpu.core_type<tc>, window_params = [{transform_indices = @transform_0, window_bounds = array<i64: 128, 128>}, {pipeline_mode = #tpu.pipeline_mode<synchronous>, transform_indices = @transform_1, window_bounds = array<i64: 64, 128>}, {pipeline_mode = #tpu.pipeline_mode<synchronous>, transform_indices = @transform_2, window_bounds = array<i64: 64, 1>}, {pipeline_mode = #tpu.pipeline_mode<synchronous>, transform_indices = @transform_3, window_bounds = array<i64: 64, 1>}, {transform_indices = @transform_4, window_bounds = array<i64: 1>}, {transform_indices = @transform_5, window_bounds = array<i64: 8, 128>}, {transform_indices = @transform_6, window_bounds = array<i64: 8, 128>}]} {
    %c0 = arith.constant 0 : index
    %c0_0 = arith.constant 0 : index
    %0 = vector.load %arg2[%c0, %c0_0] : memref<64x128xbf16, #tpu.memory_space<vmem>>, vector<64x128xbf16>
    %c0_1 = arith.constant 0 : index
    %c0_2 = arith.constant 0 : index
    %1 = vector.load %arg1[%c0_1, %c0_2] : memref<128x128xbf16, #tpu.memory_space<vmem>>, vector<128x128xbf16>
    %cst = arith.constant dense<0.000000e+00> : vector<64x128xf32>
    %2 = tpu.matmul %0, %1, %cst {dimension_numbers = #tpu.dot_dimension_numbers<[1], [0], [0], [1], [0, 0, 1, 1], [], []>} : vector<64x128xbf16>, vector<128x128xbf16>, vector<64x128xf32> -> vector<64x128xf32>
    %c0_3 = arith.constant 0 : index
    %c0_4 = arith.constant 0 : index
    %3 = vector.load %arg3[%c0_3, %c0_4] : memref<64x1xf32, #tpu.memory_space<vmem>>, vector<64x1xf32>
    %4 = vector.broadcast %3 : vector<64x1xf32> to vector<64x128xf32>
    %5 = arith.addf %2, %4 : vector<64x128xf32>
    %cst_5 = arith.constant 0.000000e+00 : f32
    %6 = vector.broadcast %cst_5 : f32 to vector<64x128xf32>
    %7 = arith.cmpf oge, %5, %6 : vector<64x128xf32>
    %cst_6 = arith.constant 0.00999999977 : f32
    %8 = vector.broadcast %cst_6 : f32 to vector<64x128xf32>
    %9 = arith.mulf %8, %5 : vector<64x128xf32>
    %10 = arith.select %7, %5, %9 : vector<64x128xi1>, vector<64x128xf32>
    %c0_7 = arith.constant 0 : index
    %c0_8 = arith.constant 0 : index
    %11 = vector.load %arg4[%c0_7, %c0_8] : memref<64x1xf32, #tpu.memory_space<vmem>>, vector<64x1xf32>
    %12 = vector.broadcast %11 : vector<64x1xf32> to vector<64x128xf32>
    %13 = arith.mulf %10, %12 : vector<64x128xf32>
    %cst_9 = arith.constant dense<0.000000e+00> : vector<128xf32>
    %14 = vector.multi_reduction <add>, %13, %cst_9 [0] : vector<64x128xf32> to vector<128xf32>
    %15 = vector.shape_cast %14 : vector<128xf32> to vector<1x128xf32>
    %c0_10 = arith.constant 0 : index
    %16 = memref.load %arg5[%c0_10] : memref<1xf32, #tpu.memory_space<smem>>
    %17 = vector.broadcast %16 : f32 to vector<1x128xf32>
    %18 = arith.addf %15, %17 : vector<1x128xf32>
    %c0_11 = arith.constant 0 : index
    %c0_12 = arith.constant 0 : index
    %19 = vector.load %arg6[%c0_11, %c0_12] : memref<8x128xf32, #tpu.memory_space<vmem>>, vector<8x128xf32>
    %20 = arith.mulf %19, %19 : vector<8x128xf32>
    %cst_13 = arith.constant dense<0.000000e+00> : vector<128xf32>
    %21 = vector.multi_reduction <add>, %20, %cst_13 [0] : vector<8x128xf32> to vector<128xf32>
    %22 = vector.shape_cast %21 : vector<128xf32> to vector<1x128xf32>
    %23 = math.sqrt %22 : vector<1x128xf32>
    %cst_14 = arith.constant 9.99999997E-7 : f32
    %24 = vector.broadcast %cst_14 : f32 to vector<1x128xf32>
    %25 = arith.addf %23, %24 : vector<1x128xf32>
    %26 = tpu.reciprocal %25 {approx = true} : vector<1x128xf32> -> vector<1x128xf32>
    %27 = vector.broadcast %26 : vector<1x128xf32> to vector<8x128xf32>
    %28 = arith.mulf %19, %27 : vector<8x128xf32>
    %29 = vector.broadcast %18 : vector<1x128xf32> to vector<8x128xf32>
    %30 = arith.mulf %28, %29 : vector<8x128xf32>
    %31 = arith.truncf %30 : vector<8x128xf32> to vector<8x128xbf16>
    %c0_15 = arith.constant 0 : index
    %c0_16 = arith.constant 0 : index
    %32 = vector.load %arg7[%c0_15, %c0_16] : memref<8x128xbf16, #tpu.memory_space<vmem>>, vector<8x128xbf16>
    tpu.vector_store %arg7[%c0_15, %c0_16], %31 {strides = array<i32>} : memref<8x128xbf16, #tpu.memory_space<vmem>>, vector<8x128xbf16>,
    return
  }
  func.func @transform_0(%arg0: i32) -> (i32, i32) {
    %c0_i32 = arith.constant 0 : i32
    %c0_i32_0 = arith.constant 0 : i32
    return %c0_i32, %arg0 : i32, i32
  }
  func.func @transform_1(%arg0: i32) -> (i32, i32) {
    %c0_i32 = arith.constant 0 : i32
    %c0_i32_0 = arith.constant 0 : i32
    %c0_i32_1 = arith.constant 0 : i32
    return %c0_i32, %c0_i32_0 : i32, i32
  }
  func.func @transform_2(%arg0: i32) -> (i32, i32) {
    %c0_i32 = arith.constant 0 : i32
    %c0_i32_0 = arith.constant 0 : i32
    %c0_i32_1 = arith.constant 0 : i32
    return %c0_i32, %c0_i32_0 : i32, i32
  }
  func.func @transform_3(%arg0: i32) -> (i32, i32) {
    %c0_i32 = arith.constant 0 : i32
    %c0_i32_0 = arith.constant 0 : i32
    %c0_i32_1 = arith.constant 0 : i32
    return %c0_i32, %c0_i32_0 : i32, i32
  }
  func.func @transform_4(%arg0: i32) -> i32 {
    %c0_i32 = arith.constant 0 : i32
    %c0_i32_0 = arith.constant 0 : i32
    return %c0_i32 : i32
  }
  func.func @transform_5(%arg0: i32) -> (i32, i32) {
    %c0_i32 = arith.constant 0 : i32
    %c0_i32_0 = arith.constant 0 : i32
    return %c0_i32, %arg0 : i32, i32
  }
  func.func @transform_6(%arg0: i32) -> (i32, i32) {
    %c0_i32 = arith.constant 0 : i32
    %c0_i32_0 = arith.constant 0 : i32
    return %c0_i32, %arg0 : i32, i32
  }
}

</mosaic_0001>

<bundles_post_ra>
// kernel: tpu_custom_call.1
= control target key start
LH: loop header
LB: loop body
LE: loop exit
PB: predicated region body
PF: predicated region fallthrough
CT: control target
= control target key end

     0   :  { %v474_v2 = vmov 0   ;;  %s626_s0 = inlined_call_operand.vmem [shape: bf16[128,128], index: 0, kind: input, shape index: {}]   ;;  %s627_s1 = inlined_call_operand.vmem [shape: bf16[64,128], index: 1, kind: input, shape index: {}]   ;;  %s628_s2 = inlined_call_operand.vmem [shape: f32[64,1], index: 2, kind: input, shape index: {}]   ;;  %s629_s3 = inlined_call_operand.vmem [shape: f32[64,1], index: 3, kind: input, shape index: {}]   ;;  %s630_s4 = inlined_call_operand.<no memory space> [shape: f32[1], index: 4, kind: input, shape index: {}]   ;;  %s631_s5 = inlined_call_operand.vmem [shape: f32[8,128], index: 5, kind: input, shape index: {}]   ;;  %s632_s6 = inlined_call_operand.hbm [shape: bf16[8,128], index: 6, kind: output, shape index: {}]  }
   0x1   :  { %v434_v0 = vld [vmem:[%s626_s0] sm:$0xff]   ;;  %v435_v1 = vld [vmem:[%s626_s0 + $0x8] sm:$0xff]   ;;  %432 = vset.pattern.permute.xlu0 %v474_v2  ;;  %433 = vset.pattern.permute.xlu1 %v474_v2  ;;  %v436_v3 = vld [vmem:[%s626_s0 + $0x10] sm:$0xff]  }
   0x2   :  { %390 = vmatprep.subr.bf16.mxu0 %v434_v0  ;;  %414 = vmatprep.subr.bf16.mxu1 %v434_v0  ;;  %v437_v4 = vld [vmem:[%s626_s0 + $0x18] sm:$0xff]   ;;  %v442_v5 = vld [vmem:[%s627_s1] sm:$0xff]   ;;  %v443_v6 = vld [vmem:[%s627_s1 + $0x10] sm:$0xff]  }
   0x3   :  { %391 = vmatpush3.bf16.msra.mxu0 %v434_v0  ;;  %422 = vmatpush3.bf16.msra.mxu1 %v434_v0  ;;  %v438_v7 = vld [vmem:[%s626_s0 + $0x20] sm:$0xff]   ;;  %v52_v9 = vld [vmem:[%s628_s2 + $0x10] sm:$0xff]  ;;  %v51_v10 = vld [vmem:[%s628_s2 + $0x8] sm:$0xff] }
   0x4   :  { %392 = vmatprep.subr.bf16.mxu0 %v435_v1  ;;  %415 = vmatprep.subr.bf16.mxu1 %v435_v1  ;;  %v50_v8 = vld [vmem:[%s628_s2] sm:$0xff]  ;;  %v53_v11 = vld [vmem:[%s628_s2 + $0x18] sm:$0xff]  ;;  %v439_v12 = vld [vmem:[%s626_s0 + $0x28] sm:$0xff]  }
   0x5   :  { %406 = vmatprep.mubr.bf16.mxu0 %v442_v5  ;;  %410 = vmatprep.mubr.bf16.mxu1 %v443_v6 }
   0x6   :  { %60 = vperm.xlu0 %432, %v50_v8   ;;  %70 = vperm.xlu1 %433, %v52_v9  }
   0x7   :  { %393 = vmatpush3.bf16.msra.mxu0 %v435_v1  ;;  %423 = vmatpush3.bf16.msra.mxu1 %v435_v1 }
   0x8   :  { %394 = vmatprep.subr.bf16.mxu0 %v436_v3  ;;  %416 = vmatprep.subr.bf16.mxu1 %v436_v3 }
   0xa   :  { %65 = vperm.xlu0 %432, %v51_v10  }
   0xb   :  { %395 = vmatpush3.bf16.msra.mxu0 %v436_v3  ;;  %424 = vmatpush3.bf16.msra.mxu1 %v436_v3 }
   0xc   :  { %396 = vmatprep.subr.bf16.mxu0 %v437_v4  ;;  %417 = vmatprep.subr.bf16.mxu1 %v437_v4 }
   0xf   :  { %397 = vmatpush3.bf16.msra.mxu0 %v437_v4  ;;  %425 = vmatpush3.bf16.msra.mxu1 %v437_v4 }
  0x10   :  { %398 = vmatprep.subr.bf16.mxu0 %v438_v7  ;;  %418 = vmatprep.subr.bf16.mxu1 %v438_v7 }
  0x11   :  { %12 = vsyncpa [#allocation4], 0  ;;  %75 = vperm.xlu1 %433, %v53_v11   ;;  %v259_v13 = vld [vmem:[%s629_s3] sm:$0xff]  ;;  %v260_v14 = vld [vmem:[%s629_s3 + $0x8] sm:$0xff] }
  0x12   :  { %v440_v15 = vld [vmem:[%s626_s0 + $0x30] sm:$0xff]   ;;  %269 = vperm.xlu0 %432, %v259_v13   ;;  %v54_v16 = vld [vmem:[%s628_s2 + $0x20] sm:$0xff]  ;;  %v441_v18 = vld [vmem:[%s626_s0 + $0x38] sm:$0xff]  }
  0x13   :  { %399 = vmatpush3.bf16.msra.mxu0 %v438_v7  ;;  %426 = vmatpush3.bf16.msra.mxu1 %v438_v7  ;;  %v261_v17 = vld [vmem:[%s629_s3 + $0x10] sm:$0xff]  ;;  %v55_v19 = vld [vmem:[%s628_s2 + $0x28] sm:$0xff]  ;;  %v262_v20 = vld [vmem:[%s629_s3 + $0x18] sm:$0xff] }
  0x14   :  { %400 = vmatprep.subr.bf16.mxu0 %v439_v12  ;;  %419 = vmatprep.subr.bf16.mxu1 %v439_v12  ;;  %v444_v21 = vld [vmem:[%s627_s1 + $0x8] sm:$0xff]   ;;  %v445_v22 = vld [vmem:[%s627_s1 + $0x18] sm:$0xff]   ;;  %v56_v23 = vld [vmem:[%s628_s2 + $0x30] sm:$0xff] }
  0x15   :  { %274 = vperm.xlu1 %433, %v260_v14   ;;  %v263_v24 = vld [vmem:[%s629_s3 + $0x20] sm:$0xff]  ;;  %v57_v25 = vld [vmem:[%s628_s2 + $0x38] sm:$0xff]  ;;  %v264_v26 = vld [vmem:[%s629_s3 + $0x28] sm:$0xff] }
  0x16   :  { %80 = vperm.xlu0 %432, %v54_v16   ;;  %v265_v27 = vld [vmem:[%s629_s3 + $0x30] sm:$0xff]  ;;  %v266_v28 = vld [vmem:[%s629_s3 + $0x38] sm:$0xff]  ;;  %v598_v29 = vld [vmem:[%s631_s5] sm:$0xff]  ;;  %s475_s5 = smov [#allocation3]  }
  0x17   :  { %401 = vmatpush3.bf16.msra.mxu0 %v439_v12  ;;  %427 = vmatpush3.bf16.msra.mxu1 %v439_v12  ;;  %v332_v30 = vmul.f32 %v598_v29, %v598_v29  ;;  %s358_s29 = sshll.u32 %s475_s5, 4  ;;  %s359_s29 = int_to_ptr.vmem [resolvable:$true] %s358_s29 }
  0x18   :  { %402 = vmatprep.subr.bf16.mxu0 %v440_v15  ;;  %420 = vmatprep.subr.bf16.mxu1 %v440_v15  ;;  %s450_s30 = scalar_lea.vmem %s359_s29, 64  ;;  %p455_p1 = scmp.lt.s32.totalorder %s359_s29, %s359_s29 }
  0x19   :  { %279 = vperm.xlu1 %433, %v261_v17   ;;  %v333_v31 = vrot.slane %v332_v30, 4  ;;  %p451_p0 = scmp.ne.s32.totalorder %s359_s29, %s450_s30  ;;  %p456_p2 = scmp.lt.s32.totalorder %s450_s30, %s450_s30 }
  0x1a   :  { %85 = vperm.xlu0 %432, %v55_v19  }
  0x1b   :  { %403 = vmatpush3.bf16.msra.mxu0 %v440_v15  ;;  %428 = vmatpush3.bf16.msra.mxu1 %v440_v15  ;;  %v334_v33 = vadd.f32 %v333_v31, %v332_v30  ;;  %p457_p3 = por %p456_p2, %p455_p1 }
  0x1c   :  { %404 = vmatprep.subr.bf16.mxu0 %v441_v18  ;;  %421 = vmatprep.subr.bf16.mxu1 %v441_v18 }
  0x1d   :  { %284 = vperm.xlu1 %433, %v262_v20   ;;  %v335_v36 = vrot.slane %v334_v33, 2  ;;  %p458_p4 = pnand %p457_p3, %p451_p0 }
  0x1e   :  { %90 = vperm.xlu0 %432, %v56_v23  }
  0x1f   :  { %405 = vmatpush3.bf16.msra.mxu0 %v441_v18  ;;  %429 = vmatpush3.bf16.msra.mxu1 %v441_v18  ;;  %v336_v37 = vadd.f32 %v335_v36, %v334_v33 }
  0x21   :  { %289 = vperm.xlu1 %433, %v263_v24   ;;  %v337_v40 = vrot.slane %v336_v37, 1 }
  0x22   :  { %407 = vmatmul.mubr.bf16.vlgmr.msra.gmra.mrb[0].mxu0 %v444_v21  ;;  %411 = vmatmul.mubr.bf16.vlgmr.msra.gmra.mrb[0].mxu1 %v445_v22 }
  0x23   :  { %95 = vperm.xlu0 %432, %v57_v25   ;;  %v602_v43 = vadd.f32 %v337_v40, %v336_v37 }
  0x25   :  { %294 = vperm.xlu1 %433, %v264_v26   ;;  %446 = vrsqrt.f32 %v602_v43  ;;  %vm341_vm5 = vcmp.eq.f32.partialorder %v602_v43, inf  ;;  %v344_v18 = vand.u32 2147483648, %v602_v43  ;;  %vm343_vm7 = vcmp.eq.f32.partialorder %v602_v43, 0.0 }
  0x27   :  { %299 = vperm.xlu0 %432, %v265_v27  }
  0x29   :  { %304 = vperm.xlu1 %433, %v266_v28  }
  0x2f   :  { %v447_v60 = vpop.eup %446 }
  0x30   :  { %v340_v4 = vmul.f32 %v447_v60, %v602_v43 }
  0x32   :  { %v342_v21 = vsel %vm341_vm5, %v602_v43, %v340_v4 }
  0x33   :  { %v345_v30 = vsel %vm343_vm7, %v344_v18, %v342_v21 }
  0x34   :  { %v346_v36 = vadd.f32 1e-06, %v345_v30 }
  0x36   :  { %448 = vrcp.f32 %v346_v36 }
  0x85   :  { %v61_v32 = vpop.permute.xlu0 %60  ;;  %v71_v34 = vpop.permute.xlu1 %70 }
  0x89   :  { %v66_v35 = vpop.permute.xlu0 %65 }
  0x90   :  { %v76_v38 = vpop.permute.xlu1 %75 }
  0x91   :  { %v270_v39 = vpop.permute.xlu0 %269 }
  0x94   :  { %v275_v41 = vpop.permute.xlu1 %274 }
  0x95   :  { %v81_v42 = vpop.permute.xlu0 %80 }
  0x98   :  { %v280_v44 = vpop.permute.xlu1 %279 }
  0x99   :  { %v86_v45 = vpop.permute.xlu0 %85 }
  0x9c   :  { %v285_v57 = vpop.permute.xlu1 %284 }
  0x9d   :  { %v91_v59 = vpop.permute.xlu0 %90 }
  0xa0   :  { %v290_v5 = vpop.permute.xlu1 %289 }
  0xa2   :  { %v96_v10 = vpop.permute.xlu0 %95 }
  0xa4   :  { %v295_v24 = vpop.permute.xlu1 %294 }
  0xf5   :  { %v408_v46 = vpop.f32.mrb[0].mxu0  ;;  %v412_v47 = vpop.f32.mrb[0].mxu1 }
  0xf6   :  { %v204_v48 = vpop.f32.mrb[1].mxu0  ;;  %v220_v49 = vpop.f32.mrb[1].mxu1  ;;  %v213_v53 = vadd.f32 %v408_v46, %v71_v34  ;;  %v229_v7 = vadd.f32 %v412_v47, %v91_v59 }
  0xf7   :  { %v205_v50 = vadd.f32 %v204_v48, %v61_v32  ;;  %v409_v51 = vpop.f32.mrb[2].mxu0  ;;  %v413_v52 = vpop.f32.mrb[2].mxu1  ;;  %v221_v62 = vadd.f32 %v220_v49, %v81_v42  ;;  %v329_v49 = vstv %s630_s4 }
  0xf8   :  { %v207_v55 = vpop.f32.mrb[3].mxu0  ;;  %v223_v56 = vpop.f32.mrb[3].mxu1  ;;  %v216_v58 = vadd.f32 %v409_v51, %v76_v38  ;;  %v245_v61 = vmul.f32 0.01, %v213_v53  ;;  %vm237_vm1 = vcmp.ge.f32.partialorder %v213_v53, 0.0  ;;  %v232_v14 = vadd.f32 %v413_v52, %v96_v10 }
  0xf9   :  { %v243_v54 = vmul.f32 0.01, %v205_v50  ;;  %vm235_vm0 = vcmp.ge.f32.partialorder %v205_v50, 0.0  ;;  %v208_v63 = vadd.f32 %v207_v55, %v66_v35  ;;  %v224_v3 = vadd.f32 %v223_v56, %v86_v45  ;;  %v300_v34 = vpop.permute.xlu0 %299  ;;  %v449_v47 = vpop.eup %448 }
  0xfa   :  { %v246_v1 = vmul.f32 0.01, %v216_v58  ;;  %vm238_vm3 = vcmp.ge.f32.partialorder %v216_v58, 0.0  ;;  %v253_v6 = vsel %vm237_vm1, %v213_v53, %v245_v61  ;;  %v247_v8 = vmul.f32 0.01, %v221_v62 }
  0xfb   :  { %v251_v0 = vsel %vm235_vm0, %v205_v50, %v243_v54  ;;  %vm236_vm2 = vcmp.ge.f32.partialorder %v208_v63, 0.0  ;;  %v244_v2 = vmul.f32 0.01, %v208_v63  ;;  %vm239_vm4 = vcmp.ge.f32.partialorder %v221_v62, 0.0 }
  0xfc   :  { %v307_v11 = vmul.f32 %v270_v39, %v251_v0  ;;  %v254_v13 = vsel %vm238_vm3, %v216_v58, %v246_v1  ;;  %v248_v15 = vmul.f32 0.01, %v224_v3  ;;  %v309_v16 = vmul.f32 %v280_v44, %v253_v6  ;;  %v305_v39 = vpop.permute.xlu1 %304 }
  0xfd   :  { %v252_v9 = vsel %vm236_vm2, %v208_v63, %v244_v2  ;;  %vm240_vm6 = vcmp.ge.f32.partialorder %v224_v3, 0.0  ;;  %v249_v19 = vmul.f32 0.01, %v229_v7  ;;  %v255_v20 = vsel %vm239_vm4, %v221_v62, %v247_v8 }
  0xfe   :  { %v308_v12 = vmul.f32 %v275_v41, %v252_v9  ;;  %vm241_vm8 = vcmp.ge.f32.partialorder %v229_v7, 0.0  ;;  %v310_v22 = vmul.f32 %v285_v57, %v254_v13  ;;  %v250_v25 = vmul.f32 0.01, %v232_v14 }
  0xff   :  { %v256_v26 = vsel %vm240_vm6, %v224_v3, %v248_v15  ;;  %v311_v27 = vmul.f32 %v290_v5, %v255_v20  ;;  %vm242_vm9 = vcmp.ge.f32.partialorder %v232_v14, 0.0  ;;  %v257_v31 = vsel %vm241_vm8, %v229_v7, %v249_v19 }
 0x100   :  { %v315_v17 = vadd.f32 %v308_v12, %v307_v11  ;;  %v312_v32 = vmul.f32 %v295_v24, %v256_v26  ;;  %v258_v35 = vsel %vm242_vm9, %v232_v14, %v250_v25  ;;  %v313_v37 = vmul.f32 %v300_v34, %v257_v31 }
 0x101   :  { %v314_v40 = vmul.f32 %v305_v39, %v258_v35  ;;  %v348_v51 = vmul.f32 %v449_v47, %v598_v29 }
 0x102   :  { %v316_v23 = vadd.f32 %v315_v17, %v309_v16 }
 0x104   :  { %v317_v28 = vadd.f32 %v316_v23, %v310_v22 }
 0x106   :  { %v318_v33 = vadd.f32 %v317_v28, %v311_v27 }
 0x108   :  { %v319_v38 = vadd.f32 %v318_v33, %v312_v32 }
 0x10a   :  { %v320_v41 = vadd.f32 %v319_v38, %v313_v37 }
 0x10c   :  { %v321_v42 = vadd.f32 %v320_v41, %v314_v40 }
 0x10e   :  { %v322_v43 = vrot.slane %v321_v42, 4 }
 0x110   :  { %v323_v44 = vadd.f32 %v322_v43, %v321_v42 }
 0x112   :  { %v324_v45 = vrot.slane %v323_v44, 2 }
 0x114   :  { %v325_v46 = vadd.f32 %v324_v45, %v323_v44 }
 0x116   :  { %v326_v48 = vrot.slane %v325_v46, 1 }
 0x118   :  { %v327_v50 = vadd.f32 %v326_v48, %v325_v46 }
 0x11a   :  { %v330_v52 = vadd.f32 %v329_v49, %v327_v50 }
 0x11c   :  { %v349_v53 = vmul.f32 %v348_v51, %v330_v52 }
 0x11e   :  { %v350_v54 = vpack.c.bf16 %v349_v53, %v349_v53 }
 0x120   :  { %351 = vst [vmem:[#allocation3] sm:$0xf] %v350_v54 }
 0x121   :  { %461 = shalt.err (!%p458_p4)
}
 0x122   :  { %s462_s4 = scalar_lea.hbm %s632_s6, 64 }
 0x123   :  { %p463_p5 = scmp.ne.s32.totalorder %s632_s6, %s462_s4  ;;  %p466_p6 = scmp.lt.u32.totalorder %s462_s4, %s632_s6 }
 0x125   :  { %p468_p7 = pnand %p466_p6, %p463_p5 }
 0x127   :  { %471 = shalt.err (!%p468_p7)
}
 0x128   :  { %361 = dma.vmem_to_hbm [thread:$0]  %s359_s29, 64, %s632_s6, [#allocation4]  }
 0x129   :  { %472 = dma.done.wait [#allocation4], 64  }
 0x12a   :  { %473 = vsyncadd [#allocation4], 4294967232 }
 0x12b   :  { %365 = vsyncpa [#allocation4], 1 }

</bundles_post_ra>
